<compile_context>
chip_gen: v7x
topology: tpu7x:2x2x1
jax: 0.10.0
libtpu: 0.0.40
codegen_flags: <defaults>
</compile_context>

<pallas_src>
import jax
import jax.numpy as jnp
import numpy as np
from jax.experimental import pallas as pl
from jax.experimental.pallas import tpu as pltpu


def _qp_attention_kernel(p_ref, w_ref, g_ref, b_ref, o_ref):
    # p_ref : (1, 9*C, H*W) im2col patches for one batch element (rows = tap*C + cin)
    # w_ref : (C, 9*C)      conv weights, columns ordered tap*C + cin
    # g_ref : (1, C, 1)     gamma
    # b_ref : (1, C, 1)     beta_eff = gamma*bias + beta
    # o_ref : (1, C, H*W)
    C = w_ref.shape[0]

    # Single fused 3x3 conv: (C, 9C) @ (9C, HW) on the MXU, f32 accumulation.
    conv = jnp.dot(w_ref[...], p_ref[0], preferred_element_type=jnp.float32)

    # Residual input = center tap of the im2col matrix (rows 4C:5C == unpadded x).
    x_center = p_ref[0, 4 * C:5 * C, :]                       # (C, HW)

    # FiLM (bias already folded into b_ref) + residual, lane-dense store.
    y = x_center + g_ref[0] * conv + b_ref[0]                 # (C, HW)
    o_ref[0] = y.astype(o_ref.dtype)


def qp_attention(x_nchw, gamma, beta, w_oihw, bias):
    """x_nchw: (B, C, H, W); gamma, beta: (B, C); w_oihw: (C, C, 3, 3); bias: (C,)."""
    B, C, H, W = x_nchw.shape
    HW = H * W

    # im2col in the wrapper (XLA): rows ordered tap-major, tap = ky*3 + kx.
    xp = jnp.pad(x_nchw, ((0, 0), (0, 0), (1, 1), (1, 1)))    # SAME padding for 3x3
    taps = [xp[:, :, ky:ky + H, kx:kx + W]                    # each (B, C, H, W)
            for ky in range(3) for kx in range(3)]
    patches = jnp.stack(taps, axis=1).reshape(B, 9 * C, HW)   # (B, 9C, HW)

    # Weights in matching (cout, tap*C + cin) order.
    w_taps = jnp.transpose(w_oihw, (0, 2, 3, 1)).reshape(C, 9 * C)

    g3 = gamma.reshape(B, C, 1)
    beta_eff = (gamma * bias[None, :] + beta).reshape(B, C, 1)

    out = pl.pallas_call(
        _qp_attention_kernel,
        out_shape=jax.ShapeDtypeStruct((B, C, HW), x_nchw.dtype),
        grid=(B,),
        in_specs=[
            pl.BlockSpec((1, 9 * C, HW), lambda b: (b, 0, 0)),
            pl.BlockSpec((C, 9 * C), lambda b: (0, 0)),
            pl.BlockSpec((1, C, 1), lambda b: (b, 0, 0)),
            pl.BlockSpec((1, C, 1), lambda b: (b, 0, 0)),
        ],
        out_specs=pl.BlockSpec((1, C, HW), lambda b: (b, 0, 0)),
        compiler_params=pltpu.CompilerParams(
            dimension_semantics=("parallel",)),
    )(patches, w_taps, g3, beta_eff)

    return out.reshape(B, C, H, W)                            # free contiguous reshape


def _reference(x_nchw, gamma, beta, w_oihw, bias):
    conv = jax.lax.conv_general_dilated(
        x_nchw, w_oihw, window_strides=(1, 1), padding="SAME",
        dimension_numbers=("NCHW", "OIHW", "NCHW"))
    conv = conv + bias[None, :, None, None]
    res = gamma[:, :, None, None] * conv + beta[:, :, None, None]
    return x_nchw + res


if __name__ == "__main__":
    B, C, H, W = 2, 48, 16, 16   # QPAttention default in_channels=48

    key = jax.random.PRNGKey(0)
    kx, kg, kb, kw, kbias = jax.random.split(key, 5)

    x = jax.random.normal(kx, (B, C, H, W), dtype=jnp.float32)
    gamma = jax.random.normal(kg, (B, C), dtype=jnp.float32)
    beta = jax.random.normal(kb, (B, C), dtype=jnp.float32)

    # Deterministic conv parameters (Conv2d(C, C, 3, 3) weight/bias shapes).
    fan_in = C * 3 * 3
    bound = 1.0 / np.sqrt(fan_in)
    w_oihw = jax.random.uniform(kw, (C, C, 3, 3), jnp.float32, -bound, bound)
    bias = jax.random.uniform(kbias, (C,), jnp.float32, -bound, bound)

    out = qp_attention(x, gamma, beta, w_oihw, bias)
    out = jax.block_until_ready(out)

    ref = _reference(x, gamma, beta, w_oihw, bias)
    np.testing.assert_allclose(np.asarray(out), np.asarray(ref),
                               rtol=1e-4, atol=1e-4)
    print("KERNEL_OK")
</pallas_src>

<mosaic_0001>
module attributes {stable_mosaic.version = 11 : i64} {
  func.func @_qp_attention_kernel(%arg0: i32, %arg1: memref<1x432x256xf32, #tpu.memory_space<vmem>>, %arg2: memref<48x432xf32, #tpu.memory_space<vmem>>, %arg3: memref<1x48x1xf32, #tpu.memory_space<vmem>>, %arg4: memref<1x48x1xf32, #tpu.memory_space<vmem>>, %arg5: memref<1x48x256xf32, #tpu.memory_space<vmem>>) attributes {dimension_semantics = [#tpu.dimension_semantics<parallel>], iteration_bounds = array<i64: 2>, scalar_prefetch = 0 : i64, scratch_operands = 0 : i64, tpu.core_type = #tpu.core_type<tc>, window_params = [{transform_indices = @transform_0, window_bounds = array<i64: 1, 432, 256>}, {pipeline_mode = #tpu.pipeline_mode<synchronous>, transform_indices = @transform_1, window_bounds = array<i64: 48, 432>}, {transform_indices = @transform_2, window_bounds = array<i64: 1, 48, 1>}, {transform_indices = @transform_3, window_bounds = array<i64: 1, 48, 1>}, {transform_indices = @transform_4, window_bounds = array<i64: 1, 48, 256>}]} {
    %c0 = arith.constant 0 : index
    %c0_0 = arith.constant 0 : index
    %0 = vector.load %arg2[%c0, %c0_0] : memref<48x432xf32, #tpu.memory_space<vmem>>, vector<48x432xf32>
    %c0_1 = arith.constant 0 : index
    %c0_2 = arith.constant 0 : index
    %c0_3 = arith.constant 0 : index
    %1 = vector.load %arg1[%c0_1, %c0_2, %c0_3] : memref<1x432x256xf32, #tpu.memory_space<vmem>>, vector<1x432x256xf32>
    %2 = vector.shape_cast %1 : vector<1x432x256xf32> to vector<432x256xf32>
    %cst = arith.constant dense<0.000000e+00> : vector<48x256xf32>
    %3 = tpu.matmul %0, %2, %cst {dimension_numbers = #tpu.dot_dimension_numbers<[1], [0], [0], [1], [0, 0, 1, 1], [], []>} : vector<48x432xf32>, vector<432x256xf32>, vector<48x256xf32> -> vector<48x256xf32>
    %c0_4 = arith.constant 0 : index
    %c192 = arith.constant 192 : index
    %c0_5 = arith.constant 0 : index
    %4 = vector.load %arg1[%c0_4, %c192, %c0_5] : memref<1x432x256xf32, #tpu.memory_space<vmem>>, vector<1x48x256xf32>
    %5 = vector.shape_cast %4 : vector<1x48x256xf32> to vector<48x256xf32>
    %c0_6 = arith.constant 0 : index
    %c0_7 = arith.constant 0 : index
    %c0_8 = arith.constant 0 : index
    %6 = vector.load %arg3[%c0_6, %c0_7, %c0_8] : memref<1x48x1xf32, #tpu.memory_space<vmem>>, vector<1x48x1xf32>
    %7 = vector.shape_cast %6 : vector<1x48x1xf32> to vector<48x1xf32>
    %8 = vector.broadcast %7 : vector<48x1xf32> to vector<48x256xf32>
    %9 = arith.mulf %8, %3 : vector<48x256xf32>
    %10 = arith.addf %5, %9 : vector<48x256xf32>
    %c0_9 = arith.constant 0 : index
    %c0_10 = arith.constant 0 : index
    %c0_11 = arith.constant 0 : index
    %11 = vector.load %arg4[%c0_9, %c0_10, %c0_11] : memref<1x48x1xf32, #tpu.memory_space<vmem>>, vector<1x48x1xf32>
    %12 = vector.shape_cast %11 : vector<1x48x1xf32> to vector<48x1xf32>
    %13 = vector.broadcast %12 : vector<48x1xf32> to vector<48x256xf32>
    %14 = arith.addf %10, %13 : vector<48x256xf32>
    %c0_12 = arith.constant 0 : index
    %c0_13 = arith.constant 0 : index
    %c0_14 = arith.constant 0 : index
    %15 = vector.load %arg5[%c0_12, %c0_13, %c0_14] : memref<1x48x256xf32, #tpu.memory_space<vmem>>, vector<1x48x256xf32>
    %16 = vector.shape_cast %15 : vector<1x48x256xf32> to vector<48x256xf32>
    %17 = vector.shape_cast %14 : vector<48x256xf32> to vector<1x48x256xf32>
    tpu.vector_store %arg5[%c0_12, %c0_13, %c0_14], %17 {strides = array<i32>} : memref<1x48x256xf32, #tpu.memory_space<vmem>>, vector<1x48x256xf32>,
    return
  }
  func.func @transform_0(%arg0: i32) -> (i32, i32, i32) {
    %c0_i32 = arith.constant 0 : i32
    %c0_i32_0 = arith.constant 0 : i32
    %c0_i32_1 = arith.constant 0 : i32
    return %arg0, %c0_i32, %c0_i32_0 : i32, i32, i32
  }
  func.func @transform_1(%arg0: i32) -> (i32, i32) {
    %c0_i32 = arith.constant 0 : i32
    %c0_i32_0 = arith.constant 0 : i32
    %c0_i32_1 = arith.constant 0 : i32
    return %c0_i32, %c0_i32_0 : i32, i32
  }
  func.func @transform_2(%arg0: i32) -> (i32, i32, i32) {
    %c0_i32 = arith.constant 0 : i32
    %c0_i32_0 = arith.constant 0 : i32
    %c0_i32_1 = arith.constant 0 : i32
    return %arg0, %c0_i32, %c0_i32_0 : i32, i32, i32
  }
  func.func @transform_3(%arg0: i32) -> (i32, i32, i32) {
    %c0_i32 = arith.constant 0 : i32
    %c0_i32_0 = arith.constant 0 : i32
    %c0_i32_1 = arith.constant 0 : i32
    return %arg0, %c0_i32, %c0_i32_0 : i32, i32, i32
  }
  func.func @transform_4(%arg0: i32) -> (i32, i32, i32) {
    %c0_i32 = arith.constant 0 : i32
    %c0_i32_0 = arith.constant 0 : i32
    %c0_i32_1 = arith.constant 0 : i32
    return %arg0, %c0_i32, %c0_i32_0 : i32, i32, i32
  }
}

</mosaic_0001>

<bundles_post_ra>
// kernel: tpu_custom_call.1
= control target key start
LH: loop header
LB: loop body
LE: loop exit
PB: predicated region body
PF: predicated region fallthrough
CT: control target
= control target key end

     0   :  { %9 = vsyncpa [#allocation3], 0  ;;  %s1626_s0 = inlined_call_operand.hbm [shape: f32[2,432,256], index: 0, kind: input, shape index: {}]   ;;  %s1627_s1 = inlined_call_operand.vmem [shape: f32[48,432], index: 1, kind: input, shape index: {}]   ;;  %s1628_s2 = inlined_call_operand.vmem [shape: f32[2,48,1], index: 2, kind: input, shape index: {}]   ;;  %s1629_s3 = inlined_call_operand.vmem [shape: f32[2,48,1], index: 3, kind: input, shape index: {}]   ;;  %s1630_s4 = inlined_call_operand.hbm [shape: f32[2,48,256], index: 4, kind: output, shape index: {}]  }
   0x1   :  { %11 = vsyncpa [#allocation3 + $0x1], 0 }
   0x2   :  { %12 = vsyncpa [#allocation4], 0 }
   0x3   :  { %14 = vsyncpa [#allocation4 + $0x1], 0  ;;  %s1177_s15 = smov 0   ;;  %s1179_s16 = smov 0  }
   0x4   :  { %s1181_s17 = smov 0   ;;  %s1183_s18 = smov 0  }
   0x5 LB: > { %s1198_s19 = sadd.s32 4294967295, %s1143_s18   ;;  %s852_s20 = sadd.s32 4294967294, %s1143_s18   ;;  %s1143_s18 = sphi %s1183_s18, %s1642_s18   ;;  %s1139_s17 = sphi %s1181_s17, %s1641_s17   ;;  %s1135_s16 = sphi %s1179_s16, %s1640_s16   ;;  %s1131_s15 = sphi %s1177_s15, %s1639_s15  }
   0x6   : > { %s1202_s21 = sadd.s32 1, %s1143_s18   ;;  %s27_s22 = sadd.s32 1, %s1139_s17 }
   0x7   : > { %s24_s23 = ssub.s32 %s1143_s18, %s1202_s21  ;;  %p34_p0 = scmp.ne.s32.totalorder %s1139_s17, %s1135_s16 }
   0x8   : > { %p25_p1 = scmp.eq.s32.totalorder %s24_s23, 0  ;;  %p35_p2 = scmp.eq.s32.totalorder %s1143_s18, 0 }
   0x9   : > { %p40_p3 = scmp.ne.s32.totalorder %s1135_s16, %s1131_s15  ;;  %p41_p4 = scmp.eq.s32.totalorder %s1198_s19, 0 }
   0xa   : > { %s1214_s24 = scalar_select %p25_p1, %s1139_s17, %s27_s22  }
   0xb   : > { %p36_p5 = por %p35_p2, %p34_p0  ;;  %p1216_p6 = por %p41_p4, %p40_p3 }
   0xc   : > { %p137_p7 = scmp.eq.s32.totalorder %s1198_s19, 1  ;;  %p143_p8 = scmp.eq.s32.totalorder %s852_s20, 1 }
   0xd   : > { %p1006_p10 = scmp.lt.s32.totalorder %s1143_s18, 2  ;;  %s166_s28 = sand.u32 1, %s1139_s17  }
   0xe   : > { %p1223_p11 = por %p137_p7, %p34_p0  ;;  %p1227_p12 = por %p143_p8, %p40_p3 }
   0xf   : > { %s989_s29 = smul.u32 13824, %s1143_s18  ;;  %p1238_p13 = pnand %p1006_p10, %p36_p5 }
  0x10   : > { %s1633_s26 = scalar_select %p1223_p11, 1, 0 }
  0x11   : > { %s1634_s27 = scalar_select %p1227_p12, 1, 0 }
  0x12   : > { %s988_s30 = smul.u32 864, %s166_s28  ;;  %s1236_s7 = scalar_lea.hbm %s1626_s0, %s989_s29 }
  0x13   : > { %s1244_s11 = scalar_lea.sflag [#allocation3], %s166_s28  ;;  %s1047_s12 = scalar_lea.hbm %s1236_s7, 13824 }
  0x14   : > { %s170_s9 = scalar_lea.vmem [#allocation2], %s988_s30  ;;  %p1048_p0 = scmp.ne.s32.totalorder %s1236_s7, %s1047_s12 }
  0x15   : > { %s177_s10 = sshll.u32 %s170_s9, 4  ;;  %p1049_p1 = pneg %p1238_p13  ;;  %s1242_s10 = int_to_ptr.vmem [resolvable:$true] %s177_s10 }
  0x16   : > { %s1052_s20 = scalar_lea.hbm %s1626_s0, 27648  ;;  %p1053_p4 = scmp.lt.u32.totalorder %s1236_s7, %s1626_s0 }
  0x17   : > { %p1050_p2 = pnand %p1049_p1, %p1048_p0  ;;  %p1054_p5 = scmp.lt.u32.totalorder %s1052_s20, %s1047_s12 }
  0x18   : > { %p1056_p8 = scmp.lt.u32.totalorder %s1047_s12, %s1236_s7 }
  0x19   : > { %p1051_p3 = pneg %p1050_p2  ;;  %p1055_p7 = por %p1054_p5, %p1053_p4 }
  0x1b   : > { %p1057_p10 = por %p1056_p8, %p1055_p7 }
  0x1d   : > { %p1058_p9 = pnand %p1057_p10, %p1051_p3 }
  0x1f   : > { %1061 = shalt.err (!%p1058_p9)
}
  0x20   : > { %s1062_s28 = scalar_lea.vmem %s1242_s10, 13824  ;;  %s1145_s29 = smov [#allocation2]  }
  0x21   : > { %p1063_p0 = scmp.ne.s32.totalorder %s1242_s10, %s1062_s28  ;;  %s1067_s30 = sshll.u32 %s1145_s29, 4  ;;  %s1068_s30 = int_to_ptr.vmem [resolvable:$false] %s1067_s30 }
  0x22   : > { %s1069_s5 = scalar_lea.vmem %s1068_s30, 27648  ;;  %p1070_p11 = scmp.lt.s32.totalorder %s1242_s10, %s1068_s30 }
  0x23   : > { %p1065_p2 = pnand %p1063_p0, %p1049_p1  ;;  %p1071_p4 = scmp.lt.s32.totalorder %s1069_s5, %s1062_s28 }
  0x25   : > { %p1066_p12 = pneg %p1065_p2  ;;  %p1072_p5 = por %p1071_p4, %p1070_p11 }
  0x27   : > { %p1073_p7 = pnand %p1072_p5, %p1066_p12 }
  0x29   : > { %1076 = shalt.err (!%p1073_p7)
}
  0x2a   : > { %s1146_s6 = smov 256   ;;  %s1147_s9 = smov 16  }
  0x2b   : > { %1001 = dma.hbm_to_vmem [thread:$0]  (!%p1238_p13), %s1236_s7, 13824, %s1242_s10, %s1244_s11, %s1146_s6, %s1146_s6, %s1147_s9  }
  0x2c   : > { %p856_p9 = scmp.ge.s32.totalorder %s1143_s18, 1  ;;  %p201_p1 = scmp.lt.s32.totalorder %s1143_s18, 3 }
  0x2e   : > { %p202_p3 = pnand %p856_p9, %p201_p1 }
  0x2f   : > { %s1275_s12 = sand.u32 (!%p202_p3), 1, %s1135_s16  }
  0x30   : > { %205 = sbr.rel (%p202_p3) target bundleno = 379 (0x17b), region = 36  ;;  %s208_s14 = scalar_lea.sflag (!%p202_p3), [#allocation3], %s1275_s12 }
  0x31   : > { %s990_s13 = smul.u32 (!%p202_p3), 864, %s1275_s12 }
  0x33   : > { %s1279_s20 = scalar_lea.vmem (!%p202_p3), [#allocation2], %s990_s13 }
  0x37   : > { %1122 = dma.done.wait (%p1216_p6), %s208_s14, 13824  }
  0x38   : > { %1124 = vsyncadd (%p1216_p6), %s208_s14, 4294953472  ;;  %v1148_v0 = vmov 0   ;;  %v281_v1 = vld [vmem:[%s1279_s20 + $0x8] sm:$0xff]  ;;  %v283_v2 = vld [vmem:[%s1279_s20 + $0x18] sm:$0xff]  ;;  %p246_p6 = scmp.lt.s32.totalorder %s1198_s19, 1  ;;  %vm388_vm0 = vcmask 392192  }
  0x39   : > { %1046 = vset.pattern.permute.xlu1 %v1148_v0  ;;  %1045 = vset.pattern.permute.xlu0 %v1148_v0  ;;  %v280_v3 = vld [vmem:[%s1279_s20] sm:$0xff]  ;;  %v868_v4 = vpack.c.bf16 %v283_v2, %v281_v1  ;;  %v282_v5 = vld [vmem:[%s1279_s20 + $0x10] sm:$0xff]  ;;  %v285_v6 = vld [vmem:[%s1279_s20 + $0x28] sm:$0xff]  ;;  %s993_s5 = smul.u32 1536, %s1198_s19  ;;  %p1636_p12 = scmp.ne.s32.totalorder %s1633_s26, 0 }
  0x3a   : > { %v287_v7 = vld [vmem:[%s1279_s20 + $0x38] sm:$0xff]  ;;  %v870_v8 = vpack.c.bf16 %v282_v5, %v280_v3  ;;  %v284_v10 = vld [vmem:[%s1279_s20 + $0x20] sm:$0xff]  ;;  %v286_v11 = vld [vmem:[%s1279_s20 + $0x30] sm:$0xff]  ;;  %s1363_s25 = scalar_select %p246_p6, %s1198_s19, 1 }
  0x3b   : > { %v872_v9 = vpack.c.bf16 %v287_v7, %v285_v6  ;;  %v289_v12 = vld [vmem:[%s1279_s20 + $0x48] sm:$0xff]  ;;  %869 = vmatprep.subr.bf16.mxu1 %v868_v4  ;;  %v291_v13 = vld [vmem:[%s1279_s20 + $0x58] sm:$0xff]  ;;  %v874_v14 = vpack.c.bf16 %v286_v11, %v284_v10  ;;  %v288_v16 = vld [vmem:[%s1279_s20 + $0x40] sm:$0xff]  ;;  %s1578_s7 = scalar_lea.hbm %s1630_s4, %s993_s5  ;;  %s742_s19 = scalar_lea.sflag [#allocation4], %s1275_s12 }
  0x3c   : > { %871 = vmatpush1.bf16.msra.mxu1 %v870_v8  ;;  %v876_v15 = vpack.c.bf16 %v291_v13, %v289_v12  ;;  %v290_v17 = vld [vmem:[%s1279_s20 + $0x50] sm:$0xff]  ;;  %v293_v18 = vld [vmem:[%s1279_s20 + $0x68] sm:$0xff]  ;;  %v295_v19 = vld [vmem:[%s1279_s20 + $0x78] sm:$0xff]  ;;  %s992_s22 = smul.u32 48, %s1363_s25 }
  0x3d   : > { %873 = vmatprep.subr.bf16.mxu1 %v872_v9  ;;  %v345_v20 = vld [vmem:[%s1279_s20 + $0x208] sm:$0xff]  ;;  %v347_v21 = vld [vmem:[%s1279_s20 + $0x218] sm:$0xff]  ;;  %v878_v22 = vpack.c.bf16 %v290_v17, %v288_v16  ;;  %v292_v23 = vld [vmem:[%s1279_s20 + $0x60] sm:$0xff]  ;;  %v880_v27 = vpack.c.bf16 %v295_v19, %v293_v18 }
  0x3e   : > { %v932_v24 = vpack.c.bf16 %v347_v21, %v345_v20  ;;  %v344_v25 = vld [vmem:[%s1279_s20 + $0x200] sm:$0xff]  ;;  %v346_v26 = vld [vmem:[%s1279_s20 + $0x210] sm:$0xff]  ;;  %v349_v30 = vld [vmem:[%s1279_s20 + $0x228] sm:$0xff]  ;;  %s1394_s29 = scalar_lea.vmem %s1628_s2, %s992_s22  ;;  %s1448_s13 = scalar_lea.vmem %s1629_s3, %s992_s22 }
  0x3f   : > { %v294_v28 = vld [vmem:[%s1279_s20 + $0x70] sm:$0xff]  ;;  %v934_v29 = vpack.c.bf16 %v346_v26, %v344_v25  ;;  %v351_v31 = vld [vmem:[%s1279_s20 + $0x238] sm:$0xff]  ;;  %v297_v32 = vld [vmem:[%s1279_s20 + $0x88] sm:$0xff] }
  0x40   : > { %875 = vmatpush1.bf16.msra.mxu1 %v874_v14  ;;  %v299_v33 = vld [vmem:[%s1279_s20 + $0x98] sm:$0xff]  ;;  %933 = vmatprep.subr.bf16.mxu0 %v932_v24  ;;  %v936_v34 = vpack.c.bf16 %v351_v31, %v349_v30  ;;  %v348_v35 = vld [vmem:[%s1279_s20 + $0x220] sm:$0xff]  ;;  %v350_v36 = vld [vmem:[%s1279_s20 + $0x230] sm:$0xff]  ;;  %v882_v37 = vpack.c.bf16 %v294_v28, %v292_v23 }
  0x41   : > { %877 = vmatprep.subr.bf16.mxu1 %v876_v15  ;;  %935 = vmatpush1.bf16.msra.mxu0 %v934_v29  ;;  %v296_v38 = vld [vmem:[%s1279_s20 + $0x80] sm:$0xff]  ;;  %v938_v39 = vpack.c.bf16 %v350_v36, %v348_v35  ;;  %v353_v40 = vld [vmem:[%s1279_s20 + $0x248] sm:$0xff]  ;;  %v355_v41 = vld [vmem:[%s1279_s20 + $0x258] sm:$0xff]  ;;  %v884_v42 = vpack.c.bf16 %v299_v33, %v297_v32 }
  0x42   : > { %937 = vmatprep.subr.bf16.mxu0 %v936_v34  ;;  %v298_v43 = vld [vmem:[%s1279_s20 + $0x90] sm:$0xff]  ;;  %v940_v44 = vpack.c.bf16 %v355_v41, %v353_v40  ;;  %v352_v45 = vld [vmem:[%s1279_s20 + $0x240] sm:$0xff]  ;;  %v301_v47 = vld [vmem:[%s1279_s20 + $0xa8] sm:$0xff] }
  0x43   : > { %v354_v46 = vld [vmem:[%s1279_s20 + $0x250] sm:$0xff]  ;;  %v303_v48 = vld [vmem:[%s1279_s20 + $0xb8] sm:$0xff]  ;;  %v357_v49 = vld [vmem:[%s1279_s20 + $0x268] sm:$0xff]  ;;  %v886_v52 = vpack.c.bf16 %v298_v43, %v296_v38 }
  0x44   : > { %879 = vmatpush1.bf16.msra.mxu1 %v878_v22  ;;  %v942_v50 = vpack.c.bf16 %v354_v46, %v352_v45  ;;  %v359_v51 = vld [vmem:[%s1279_s20 + $0x278] sm:$0xff]  ;;  %v300_v53 = vld [vmem:[%s1279_s20 + $0xa0] sm:$0xff]  ;;  %v358_v56 = vld [vmem:[%s1279_s20 + $0x270] sm:$0xff]  ;;  %v888_v57 = vpack.c.bf16 %v303_v48, %v301_v47 }
  0x45   : > { %881 = vmatprep.subr.bf16.mxu1 %v880_v27  ;;  %939 = vmatpush1.bf16.msra.mxu0 %v938_v39  ;;  %v944_v54 = vpack.c.bf16 %v359_v51, %v357_v49  ;;  %v356_v55 = vld [vmem:[%s1279_s20 + $0x260] sm:$0xff]  ;;  %v302_v58 = vld [vmem:[%s1279_s20 + $0xb0] sm:$0xff]  ;;  %v361_v59 = vld [vmem:[%s1279_s20 + $0x288] sm:$0xff] }
  0x46   : > { %941 = vmatprep.subr.bf16.mxu0 %v940_v44  ;;  %v363_v60 = vld [vmem:[%s1279_s20 + $0x298] sm:$0xff]  ;;  %v305_v61 = vld [vmem:[%s1279_s20 + $0xc8] sm:$0xff]  ;;  %v946_v63 = vpack.c.bf16 %v358_v56, %v356_v55  ;;  %v890_v0 = vpack.c.bf16 %v302_v58, %v300_v53  ;;  %v304_v1 = vld [vmem:[%s1279_s20 + $0xc0] sm:$0xff] }
  0x47   : > { %v307_v62 = vld [vmem:[%s1279_s20 + $0xd8] sm:$0xff]  ;;  %v948_v2 = vpack.c.bf16 %v363_v60, %v361_v59  ;;  %v360_v3 = vld [vmem:[%s1279_s20 + $0x280] sm:$0xff]  ;;  %v362_v4 = vld [vmem:[%s1279_s20 + $0x290] sm:$0xff] }
  0x48   : > { %883 = vmatpush1.bf16.msra.mxu1 %v882_v37  ;;  %v892_v5 = vpack.c.bf16 %v307_v62, %v305_v61  ;;  %v306_v6 = vld [vmem:[%s1279_s20 + $0xd0] sm:$0xff]  ;;  %v365_v7 = vld [vmem:[%s1279_s20 + $0x2a8] sm:$0xff]  ;;  %v367_v8 = vld [vmem:[%s1279_s20 + $0x2b8] sm:$0xff]  ;;  %v950_v11 = vpack.c.bf16 %v362_v4, %v360_v3 }
  0x49   : > { %885 = vmatprep.subr.bf16.mxu1 %v884_v42  ;;  %943 = vmatpush1.bf16.msra.mxu0 %v942_v50  ;;  %v309_v9 = vld [vmem:[%s1279_s20 + $0xe8] sm:$0xff]  ;;  %v311_v10 = vld [vmem:[%s1279_s20 + $0xf8] sm:$0xff]  ;;  %v894_v12 = vpack.c.bf16 %v306_v6, %v304_v1  ;;  %v308_v13 = vld [vmem:[%s1279_s20 + $0xe0] sm:$0xff]  ;;  %v952_v14 = vpack.c.bf16 %v367_v8, %v365_v7 }
  0x4a   : > { %945 = vmatprep.subr.bf16.mxu0 %v944_v54  ;;  %v364_v15 = vld [vmem:[%s1279_s20 + $0x2a0] sm:$0xff]  ;;  %v366_v16 = vld [vmem:[%s1279_s20 + $0x2b0] sm:$0xff]  ;;  %v896_v17 = vpack.c.bf16 %v311_v10, %v309_v9  ;;  %v369_v19 = vld [vmem:[%s1279_s20 + $0x2c8] sm:$0xff] }
  0x4b   : > { %v310_v18 = vld [vmem:[%s1279_s20 + $0xf0] sm:$0xff]  ;;  %v371_v20 = vld [vmem:[%s1279_s20 + $0x2d8] sm:$0xff]  ;;  %v313_v21 = vld [vmem:[%s1279_s20 + $0x108] sm:$0xff]  ;;  %v954_v23 = vpack.c.bf16 %v366_v16, %v364_v15 }
  0x4c   : > { %887 = vmatpush1.bf16.msra.mxu1 %v886_v52  ;;  %v315_v22 = vld [vmem:[%s1279_s20 + $0x118] sm:$0xff]  ;;  %v898_v24 = vpack.c.bf16 %v310_v18, %v308_v13  ;;  %v312_v25 = vld [vmem:[%s1279_s20 + $0x100] sm:$0xff]  ;;  %v956_v26 = vpack.c.bf16 %v371_v20, %v369_v19  ;;  %v370_v28 = vld [vmem:[%s1279_s20 + $0x2d0] sm:$0xff] }
  0x4d   : > { %889 = vmatprep.subr.bf16.mxu1 %v888_v57  ;;  %947 = vmatpush1.bf16.msra.mxu0 %v946_v63  ;;  %v368_v27 = vld [vmem:[%s1279_s20 + $0x2c0] sm:$0xff]  ;;  %v900_v29 = vpack.c.bf16 %v315_v22, %v313_v21  ;;  %v314_v30 = vld [vmem:[%s1279_s20 + $0x110] sm:$0xff]  ;;  %v373_v31 = vld [vmem:[%s1279_s20 + $0x2e8] sm:$0xff] }
  0x4e   : > { %949 = vmatprep.subr.bf16.mxu0 %v948_v2  ;;  %v375_v32 = vld [vmem:[%s1279_s20 + $0x2f8] sm:$0xff]  ;;  %v317_v33 = vld [vmem:[%s1279_s20 + $0x128] sm:$0xff]  ;;  %v958_v35 = vpack.c.bf16 %v370_v28, %v368_v27  ;;  %v902_v36 = vpack.c.bf16 %v314_v30, %v312_v25  ;;  %v316_v37 = vld [vmem:[%s1279_s20 + $0x120] sm:$0xff] }
  0x4f   : > { %v319_v34 = vld [vmem:[%s1279_s20 + $0x138] sm:$0xff]  ;;  %v960_v38 = vpack.c.bf16 %v375_v32, %v373_v31  ;;  %v372_v39 = vld [vmem:[%s1279_s20 + $0x2e0] sm:$0xff]  ;;  %v374_v40 = vld [vmem:[%s1279_s20 + $0x2f0] sm:$0xff] }
  0x50   : > { %891 = vmatpush1.bf16.msra.mxu1 %v890_v0  ;;  %v904_v41 = vpack.c.bf16 %v319_v34, %v317_v33  ;;  %v318_v42 = vld [vmem:[%s1279_s20 + $0x130] sm:$0xff]  ;;  %v377_v43 = vld [vmem:[%s1279_s20 + $0x308] sm:$0xff]  ;;  %v379_v44 = vld [vmem:[%s1279_s20 + $0x318] sm:$0xff]  ;;  %v962_v48 = vpack.c.bf16 %v374_v40, %v372_v39 }
  0x51   : > { %893 = vmatprep.subr.bf16.mxu1 %v892_v5  ;;  %951 = vmatpush1.bf16.msra.mxu0 %v950_v11  ;;  %v321_v45 = vld [vmem:[%s1279_s20 + $0x148] sm:$0xff]  ;;  %v323_v46 = vld [vmem:[%s1279_s20 + $0x158] sm:$0xff]  ;;  %v320_v47 = vld [vmem:[%s1279_s20 + $0x140] sm:$0xff]  ;;  %v906_v50 = vpack.c.bf16 %v318_v42, %v316_v37  ;;  %v964_v51 = vpack.c.bf16 %v379_v44, %v377_v43 }
  0x52   : > { %953 = vmatprep.subr.bf16.mxu0 %v952_v14  ;;  %v376_v49 = vld [vmem:[%s1279_s20 + $0x300] sm:$0xff]  ;;  %v378_v52 = vld [vmem:[%s1279_s20 + $0x310] sm:$0xff]  ;;  %v259_v53 = vld [vmem:[%s1627_s1 + $0x18] sm:$0xff]  ;;  %v908_v55 = vpack.c.bf16 %v323_v46, %v321_v45 }
  0x53   : > { %v257_v54 = vld [vmem:[%s1627_s1 + $0x8] sm:$0xff]  ;;  %v322_v56 = vld [vmem:[%s1279_s20 + $0x150] sm:$0xff]  ;;  %v383_v58 = vld [vmem:[%s1279_s20 + $0x338] sm:$0xff]  ;;  %859 = vmatprep.mubr.msk.f32.mxu0 %vm388_vm0, %v259_v53  ;;  %v966_v61 = vpack.c.bf16 %v378_v52, %v376_v49 }
  0x54   : > { %895 = vmatpush1.bf16.msra.mxu1 %v894_v12  ;;  %v381_v57 = vld [vmem:[%s1279_s20 + $0x328] sm:$0xff]  ;;  %v327_v60 = vld [vmem:[%s1279_s20 + $0x178] sm:$0xff]  ;;  %471 = vmatprep.mubr.f32.mxu1 %v257_v54  ;;  %v910_v62 = vpack.c.bf16 %v322_v56, %v320_v47  ;;  %v324_v63 = vld [vmem:[%s1279_s20 + $0x160] sm:$0xff] }
  0x55   : > { %897 = vmatprep.subr.bf16.mxu1 %v896_v17  ;;  %955 = vmatpush1.bf16.msra.mxu0 %v954_v23  ;;  %v325_v59 = vld [vmem:[%s1279_s20 + $0x168] sm:$0xff]  ;;  %v968_v0 = vpack.c.bf16 %v383_v58, %v381_v57  ;;  %v380_v1 = vld [vmem:[%s1279_s20 + $0x320] sm:$0xff]  ;;  %v382_v2 = vld [vmem:[%s1279_s20 + $0x330] sm:$0xff] }
  0x56   : > { %957 = vmatprep.subr.bf16.mxu0 %v956_v26  ;;  %v912_v3 = vpack.c.bf16 %v327_v60, %v325_v59  ;;  %v326_v4 = vld [vmem:[%s1279_s20 + $0x170] sm:$0xff]  ;;  %v385_v5 = vld [vmem:[%s1279_s20 + $0x348] sm:$0xff]  ;;  %v387_v6 = vld [vmem:[%s1279_s20 + $0x358] sm:$0xff]  ;;  %v970_v9 = vpack.c.bf16 %v382_v2, %v380_v1 }
  0x57   : > { %v1397_v7 = vld [vmem:[%s1279_s20 + $0x188] sm:$0xff]  ;;  %v1400_v8 = vld [vmem:[%s1279_s20 + $0x198] sm:$0xff]  ;;  %v384_v10 = vld [vmem:[%s1279_s20 + $0x340] sm:$0xff]  ;;  %v914_v11 = vpack.c.bf16 %v326_v4, %v324_v63  ;;  %v972_v12 = vpack.c.bf16 %v387_v6, %v385_v5 }
  0x58   : > { %899 = vmatpush1.bf16.msra.mxu1 %v898_v24  ;;  %v386_v13 = vld [vmem:[%s1279_s20 + $0x350] sm:$0xff]  ;;  %v621_v15 = vld [vmem:[%s1394_s29] sm:$0xff]  ;;  %v916_v16 = vpack.c.bf16 %v1400_v8, %v1397_v7  ;;  %v1415_v19 = vld [vmem:[%s1279_s20 + $0x1a8] sm:$0xff] }
  0x59   : > { %901 = vmatprep.subr.bf16.mxu1 %v900_v29  ;;  %959 = vmatpush1.bf16.msra.mxu0 %v958_v35  ;;  %v623_v14 = vld [vmem:[%s1394_s29 + $0x10] sm:$0xff]  ;;  %v1409_v17 = vld [vmem:[%s1279_s20 + $0x180] sm:$0xff]  ;;  %v1418_v20 = vld [vmem:[%s1279_s20 + $0x1b8] sm:$0xff]  ;;  %v974_v22 = vpack.c.bf16 %v386_v13, %v384_v10 }
  0x5a   : > { %961 = vmatprep.subr.bf16.mxu0 %v960_v38  ;;  %v1412_v18 = vld [vmem:[%s1279_s20 + $0x190] sm:$0xff]  ;;  %639 = vperm.xlu1 %1046, %v623_v14   ;;  %v624_v21 = vld [vmem:[%s1394_s29 + $0x18] sm:$0xff]  ;;  %v622_v23 = vld [vmem:[%s1394_s29 + $0x8] sm:$0xff]  ;;  %v920_v25 = vpack.c.bf16 %v1418_v20, %v1415_v19 }
  0x5b   : > { %629 = vperm.xlu0 %1045, %v621_v15   ;;  %v918_v24 = vpack.c.bf16 %v1412_v18, %v1409_v17  ;;  %v1427_v26 = vld [vmem:[%s1279_s20 + $0x1a0] sm:$0xff]  ;;  %v1430_v27 = vld [vmem:[%s1279_s20 + $0x1b0] sm:$0xff]  ;;  %v1433_v28 = vld [vmem:[%s1279_s20 + $0x1c8] sm:$0xff] }
  0x5c   : > { %903 = vmatpush1.bf16.msra.mxu1 %v902_v36  ;;  %v1436_v29 = vld [vmem:[%s1279_s20 + $0x1d8] sm:$0xff]  ;;  %v626_v30 = vld [vmem:[%s1394_s29 + $0x28] sm:$0xff]  ;;  %v258_v31 = vld [vmem:[%s1627_s1 + $0x10] sm:$0xff]  ;;  %v922_v33 = vpack.c.bf16 %v1430_v27, %v1427_v26 }
  0x5d   : > { %905 = vmatprep.subr.bf16.mxu1 %v904_v41  ;;  %963 = vmatpush1.bf16.msra.mxu0 %v962_v48  ;;  %v625_v32 = vld [vmem:[%s1394_s29 + $0x20] sm:$0xff]  ;;  %v263_v34 = vld [vmem:[%s1627_s1 + $0x38] sm:$0xff]  ;;  %v924_v35 = vpack.c.bf16 %v1436_v29, %v1433_v28  ;;  %v1461_v37 = vld [vmem:[%s1279_s20 + $0x1d0] sm:$0xff] }
  0x5e   : > { %965 = vmatprep.subr.bf16.mxu0 %v964_v51  ;;  %644 = vperm.xlu1 %1046, %v624_v21   ;;  %v1458_v36 = vld [vmem:[%s1279_s20 + $0x1c0] sm:$0xff]  ;;  %v341_v38 = vld [vmem:[%s1279_s20 + $0x1e8] sm:$0xff]  ;;  %v343_v39 = vld [vmem:[%s1279_s20 + $0x1f8] sm:$0xff] }
  0x5f   : > { %634 = vperm.xlu0 %1045, %v622_v23   ;;  %v682_v40 = vld [vmem:[%s1448_s13 + $0x8] sm:$0xff]  ;;  %v262_v41 = vld [vmem:[%s1627_s1 + $0x30] sm:$0xff]  ;;  %v681_v42 = vld [vmem:[%s1448_s13] sm:$0xff]  ;;  %v926_v43 = vpack.c.bf16 %v1461_v37, %v1458_v36  ;;  %v928_v45 = vpack.c.bf16 %v343_v39, %v341_v38 }
  0x60   : > { %907 = vmatpush1.bf16.msra.mxu1 %v906_v50  ;;  %v267_v44 = vld [vmem:[%s1627_s1 + $0x58] sm:$0xff]  ;;  %v340_v46 = vld [vmem:[%s1279_s20 + $0x1e0] sm:$0xff]  ;;  %v342_v47 = vld [vmem:[%s1279_s20 + $0x1f0] sm:$0xff]  ;;  %s991_s20 = smul.u32 96, %s1275_s12 }
  0x61   : > { %909 = vmatprep.subr.bf16.mxu1 %v908_v55  ;;  %967 = vmatpush1.bf16.msra.mxu0 %v966_v61  ;;  %v684_v48 = vld [vmem:[%s1448_s13 + $0x18] sm:$0xff]  ;;  %v266_v49 = vld [vmem:[%s1627_s1 + $0x50] sm:$0xff]  ;;  %v930_v51 = vpack.c.bf16 %v342_v47, %v340_v46  ;;  %v686_v53 = vld [vmem:[%s1448_s13 + $0x28] sm:$0xff] }
  0x62   : > { %969 = vmatprep.subr.bf16.mxu0 %v968_v0  ;;  %654 = vperm.xlu1 %1046, %v626_v30   ;;  %v683_v50 = vld [vmem:[%s1448_s13 + $0x10] sm:$0xff]  ;;  %v271_v52 = vld [vmem:[%s1627_s1 + $0x78] sm:$0xff]  ;;  %v685_v55 = vld [vmem:[%s1448_s13 + $0x20] sm:$0xff]  ;;  %s1547_s30 = scalar_lea.vmem [#allocation5], %s991_s20  ;;  %s1149_s13 = smov [#allocation5]  }
  0x63   : > { %649 = vperm.xlu0 %1045, %v625_v32   ;;  %v270_v54 = vld [vmem:[%s1627_s1 + $0x70] sm:$0xff]  ;;  %v256_v56 = vld [vmem:[%s1627_s1] sm:$0xff]  ;;  %v275_v57 = vld [vmem:[%s1627_s1 + $0x98] sm:$0xff]  ;;  %s755_s6 = sshll.u32 %s1547_s30, 4  ;;  %s1081_s8 = sshll.u32 %s1149_s13, 4  ;;  %s1580_s6 = int_to_ptr.vmem [resolvable:$true] %s755_s6  ;;  %s1082_s8 = int_to_ptr.vmem [resolvable:$false] %s1081_s8 }
  0x64   : > { %911 = vmatpush1.bf16.msra.mxu1 %v910_v62  ;;  %v261_v58 = vld [vmem:[%s1627_s1 + $0x28] sm:$0xff]  ;;  %v274_v59 = vld [vmem:[%s1627_s1 + $0x90] sm:$0xff]  ;;  %v260_v60 = vld [vmem:[%s1627_s1 + $0x20] sm:$0xff]  ;;  %s1077_s25 = scalar_lea.vmem %s1580_s6, 1536  ;;  %s1083_s10 = scalar_lea.vmem %s1082_s8, 3072 }
  0x65   : > { %913 = vmatprep.subr.bf16.mxu1 %v912_v3  ;;  %971 = vmatpush1.bf16.msra.mxu0 %v970_v9  ;;  %v279_v61 = vld [vmem:[%s1627_s1 + $0xb8] sm:$0xff]  ;;  %v265_v62 = vld [vmem:[%s1627_s1 + $0x48] sm:$0xff]  ;;  %v278_v63 = vld [vmem:[%s1627_s1 + $0xb0] sm:$0xff]  ;;  %p1078_p11 = scmp.ne.s32.totalorder %s1580_s6, %s1077_s25  ;;  %p1084_p10 = scmp.lt.s32.totalorder %s1580_s6, %s1082_s8 }
  0x66   : > { %973 = vmatprep.subr.bf16.mxu0 %v972_v12  ;;  %694 = vperm.xlu1 %1046, %v682_v40   ;;  %v264_v0 = vld [vmem:[%s1627_s1 + $0x40] sm:$0xff]  ;;  %v269_v1 = vld [vmem:[%s1627_s1 + $0x68] sm:$0xff]  ;;  %p1085_p0 = scmp.lt.s32.totalorder %s1083_s10, %s1077_s25 }
  0x67   : > { %689 = vperm.xlu0 %1045, %v681_v42   ;;  %v268_v2 = vld [vmem:[%s1627_s1 + $0x60] sm:$0xff]  ;;  %v273_v3 = vld [vmem:[%s1627_s1 + $0x88] sm:$0xff]  ;;  %p1079_p13 = pnand %p1078_p11, %p1636_p12 }
  0x68   : > { %915 = vmatpush1.bf16.msra.mxu1 %v914_v11  ;;  %v272_v4 = vld [vmem:[%s1627_s1 + $0x80] sm:$0xff]  ;;  %v277_v5 = vld [vmem:[%s1627_s1 + $0xa8] sm:$0xff]  ;;  %p1086_p2 = por %p1085_p0, %p1084_p10 }
  0x69   : > { %917 = vmatprep.subr.bf16.mxu1 %v916_v16  ;;  %975 = vmatpush1.bf16.msra.mxu0 %v974_v22  ;;  %v276_v6 = vld [vmem:[%s1627_s1 + $0xa0] sm:$0xff]  ;;  %p1080_p8 = pneg %p1079_p13 }
  0x6a   : > { %704 = vperm.xlu1 %1046, %v684_v48  }
  0x6b   : > { %699 = vperm.xlu0 %1045, %v683_v50   ;;  %p1087_p4 = pnand %p1086_p2, %p1080_p8 }
  0x6c   : > { %919 = vmatpush1.bf16.msra.mxu1 %v918_v24  ;;  %573 = vmatmul.mubr.f32.vlgmr.msra.gmra.mrb[0].mxu0 %v258_v31 }
  0x6d   : > { %921 = vmatprep.subr.bf16.mxu1 %v920_v25  ;;  %860 = vmatprep.mubr.msk.f32.mxu0 %vm388_vm0, %v263_v34 }
  0x6e   : > { %714 = vperm.xlu1 %1046, %v686_v53  }
  0x6f   : > { %709 = vperm.xlu0 %1045, %v685_v55  }
  0x70   : > { %923 = vmatpush1.bf16.msra.mxu1 %v922_v33  ;;  %579 = vmatmul.mubr.f32.gmra.mrb[2].mxu0 %v262_v41 }
  0x71   : > { %925 = vmatprep.subr.bf16.mxu1 %v924_v35  ;;  %861 = vmatprep.mubr.msk.f32.mxu0 %vm388_vm0, %v267_v44 }
  0x74   : > { %927 = vmatpush1.bf16.msra.mxu1 %v926_v43  ;;  %585 = vmatmul.mubr.f32.gmra.mrb[4].mxu0 %v266_v49 }
  0x75   : > { %929 = vmatprep.subr.bf16.mxu1 %v928_v45  ;;  %862 = vmatprep.mubr.msk.f32.mxu0 %vm388_vm0, %v271_v52 }
  0x78   : > { %931 = vmatpush1.bf16.msra.mxu1 %v930_v51  ;;  %591 = vmatmul.mubr.f32.gmra.mrb[6].mxu0 %v270_v54 }
  0x79   : > { %863 = vmatprep.mubr.msk.f32.mxu0 %vm388_vm0, %v275_v57 }
  0x7b   : > { %472 = vmatmul.mubr.f32.vlgmr.msra.gmra.mrb[0].mxu1 %v256_v56 }
  0x7c   : > { %477 = vmatprep.mubr.f32.mxu1 %v261_v58  ;;  %597 = vmatmul.mubr.f32.gmra.mrb[8].mxu0 %v274_v59 }
  0x7d   : > { %864 = vmatprep.mubr.msk.f32.mxu0 %vm388_vm0, %v279_v61 }
  0x7f   : > { %478 = vmatmul.mubr.f32.gmra.mrb[2].mxu1 %v260_v60 }
  0x80   : > { %483 = vmatprep.mubr.f32.mxu1 %v265_v62  ;;  %603 = vmatmul.mubr.f32.gmra.mrb[10].mxu0 %v278_v63 }
  0x83   : > { %484 = vmatmul.mubr.f32.gmra.mrb[4].mxu1 %v264_v0 }
  0x84   : > { %489 = vmatprep.mubr.f32.mxu1 %v269_v1 }
  0x87   : > { %490 = vmatmul.mubr.f32.gmra.mrb[6].mxu1 %v268_v2 }
  0x88   : > { %495 = vmatprep.mubr.f32.mxu1 %v273_v3 }
  0x8b   : > { %496 = vmatmul.mubr.f32.gmra.mrb[8].mxu1 %v272_v4 }
  0x8c   : > { %501 = vmatprep.mubr.f32.mxu1 %v277_v5 }
  0x8f   : > { %502 = vmatmul.mubr.f32.gmra.mrb[10].mxu1 %v276_v6 }
  0xd9   : > { %v640_v12 = vpop.permute.xlu1 %639 }
  0xda   : > { %v630_v9 = vpop.permute.xlu0 %629 }
  0xdd   : > { %v645_v22 = vpop.permute.xlu1 %644 }
  0xde   : > { %v635_v15 = vpop.permute.xlu0 %634 }
  0xe1   : > { %v1543_v34 = vpop.permute.xlu1 %654 }
  0xe2   : > { %v1540_v23 = vpop.permute.xlu0 %649 }
  0xe6   : > { %v690_v45 = vpop.permute.xlu0 %689 }
  0xea   : > { %v700_v2 = vpop.permute.xlu0 %699 }
 0x13f   : > { %v574_v10 = vpop.f32.mrb[0].mxu0 }
 0x140   : > { %v576_v11 = vpop.f32.mrb[1].mxu0 }
 0x143   : > { %v580_v13 = vpop.f32.mrb[2].mxu0 }
 0x144   : > { %v582_v14 = vpop.f32.mrb[3].mxu0 }
 0x147   : > { %v586_v16 = vpop.f32.mrb[4].mxu0 }
 0x148   : > { %v588_v21 = vpop.f32.mrb[5].mxu0 }
 0x14b   : > { %v592_v24 = vpop.f32.mrb[6].mxu0 }
 0x14c   : > { %v594_v30 = vpop.f32.mrb[7].mxu0 }
 0x14e   : > { %v473_v25 = vpop.f32.mrb[0].mxu1 }
 0x14f   : > { %v575_v31 = vadd.f32 %v574_v10, %v473_v25  ;;  %v475_v32 = vpop.f32.mrb[1].mxu1  ;;  %v598_v38 = vpop.f32.mrb[8].mxu0 }
 0x150   : > { %v577_v33 = vadd.f32 %v576_v11, %v475_v32  ;;  %v600_v41 = vpop.f32.mrb[9].mxu0 }
 0x151   : > { %v657_v35 = vmul.f32 %v630_v9, %v575_v31  ;;  %v710_v31 = vpop.permute.xlu0 %709 }
 0x152   : > { %v658_v39 = vmul.f32 %v630_v9, %v577_v33  ;;  %v479_v40 = vpop.f32.mrb[2].mxu1 }
 0x153   : > { %v669_v42 = vadd.f32 %v657_v35, %v1409_v17  ;;  %v581_v43 = vadd.f32 %v580_v13, %v479_v40  ;;  %v481_v44 = vpop.f32.mrb[3].mxu1  ;;  %v604_v50 = vpop.f32.mrb[10].mxu0 }
 0x154   : > { %v670_v46 = vadd.f32 %v658_v39, %v1397_v7  ;;  %v583_v47 = vadd.f32 %v582_v14, %v481_v44  ;;  %v606_v54 = vpop.f32.mrb[11].mxu0  ;;  %v695_v7 = vpop.permute.xlu1 %694 }
 0x155   : > { %v717_v48 = vadd.f32 %v690_v45, %v669_v42  ;;  %v659_v49 = vmul.f32 %v635_v15, %v581_v43 }
 0x156   : > { %v718_v51 = vadd.f32 %v690_v45, %v670_v46  ;;  %v660_v52 = vmul.f32 %v635_v15, %v583_v47  ;;  %v485_v53 = vpop.f32.mrb[4].mxu1 }
 0x157   : > { %729 = vst [vmem:[%s1547_s30] sm:$0xff] %v717_v48  ;;  %v671_v17 = vadd.f32 %v659_v49, %v1412_v18  ;;  %v587_v55 = vadd.f32 %v586_v16, %v485_v53  ;;  %v487_v56 = vpop.f32.mrb[5].mxu1 }
 0x158   : > { %730 = vst [vmem:[%s1547_s30 + $0x8] sm:$0xff] %v718_v51  ;;  %v672_v57 = vadd.f32 %v660_v52, %v1400_v8  ;;  %v589_v58 = vadd.f32 %v588_v21, %v487_v56  ;;  %v705_v13 = vpop.permute.xlu1 %704 }
 0x159   : > { %v719_v59 = vadd.f32 %v695_v7, %v671_v17  ;;  %v661_v60 = vmul.f32 %v640_v12, %v587_v55 }
 0x15a   : > { %v720_v61 = vadd.f32 %v695_v7, %v672_v57  ;;  %v662_v62 = vmul.f32 %v640_v12, %v589_v58  ;;  %v491_v63 = vpop.f32.mrb[6].mxu1 }
 0x15b   : > { %731 = vst [vmem:[%s1547_s30 + $0x10] sm:$0xff] %v719_v59  ;;  %v673_v0 = vadd.f32 %v661_v60, %v1427_v26  ;;  %v593_v1 = vadd.f32 %v592_v24, %v491_v63  ;;  %v493_v18 = vpop.f32.mrb[7].mxu1 }
 0x15c   : > { %732 = vst [vmem:[%s1547_s30 + $0x18] sm:$0xff] %v720_v61  ;;  %v674_v3 = vadd.f32 %v662_v62, %v1415_v19  ;;  %v595_v4 = vadd.f32 %v594_v30, %v493_v18  ;;  %v715_v39 = vpop.permute.xlu1 %714 }
 0x15d   : > { %v721_v5 = vadd.f32 %v700_v2, %v673_v0  ;;  %v663_v8 = vmul.f32 %v645_v22, %v593_v1 }
 0x15e   : > { %v722_v6 = vadd.f32 %v700_v2, %v674_v3  ;;  %v664_v9 = vmul.f32 %v645_v22, %v595_v4  ;;  %v497_v10 = vpop.f32.mrb[8].mxu1 }
 0x15f   : > { %733 = vst [vmem:[%s1547_s30 + $0x20] sm:$0xff] %v721_v5  ;;  %v675_v11 = vadd.f32 %v663_v8, %v1430_v27  ;;  %v599_v12 = vadd.f32 %v598_v38, %v497_v10  ;;  %v499_v26 = vpop.f32.mrb[9].mxu1 }
 0x160   : > { %734 = vst [vmem:[%s1547_s30 + $0x28] sm:$0xff] %v722_v6  ;;  %v676_v14 = vadd.f32 %v664_v9, %v1418_v20  ;;  %v601_v15 = vadd.f32 %v600_v41, %v499_v26 }
 0x161   : > { %v723_v19 = vadd.f32 %v705_v13, %v675_v11  ;;  %v665_v16 = vmul.f32 %v1540_v23, %v599_v12 }
 0x162   : > { %v724_v21 = vadd.f32 %v705_v13, %v676_v14  ;;  %v666_v22 = vmul.f32 %v1540_v23, %v601_v15  ;;  %v503_v24 = vpop.f32.mrb[10].mxu1 }
 0x163   : > { %735 = vst [vmem:[%s1547_s30 + $0x30] sm:$0xff] %v723_v19  ;;  %v677_v27 = vadd.f32 %v665_v16, %v1458_v36  ;;  %v605_v25 = vadd.f32 %v604_v50, %v503_v24  ;;  %v505_v30 = vpop.f32.mrb[11].mxu1 }
 0x164   : > { %736 = vst [vmem:[%s1547_s30 + $0x38] sm:$0xff] %v724_v21  ;;  %v678_v20 = vadd.f32 %v666_v22, %v1433_v28  ;;  %v607_v32 = vadd.f32 %v606_v54, %v505_v30 }
 0x165   : > { %v725_v33 = vadd.f32 %v710_v31, %v677_v27  ;;  %v667_v35 = vmul.f32 %v1543_v34, %v605_v25 }
 0x166   : > { %v726_v23 = vadd.f32 %v710_v31, %v678_v20  ;;  %v668_v38 = vmul.f32 %v1543_v34, %v607_v32 }
 0x167   : > { %737 = vst [vmem:[%s1547_s30 + $0x40] sm:$0xff] %v725_v33  ;;  %v679_v36 = vadd.f32 %v667_v35, %v1461_v37 }
 0x168   : > { %738 = vst [vmem:[%s1547_s30 + $0x48] sm:$0xff] %v726_v23  ;;  %v680_v28 = vadd.f32 %v668_v38, %v1436_v29 }
 0x169   : > { %v727_v40 = vadd.f32 %v715_v39, %v679_v36 }
 0x16a   : > { %v728_v34 = vadd.f32 %v715_v39, %v680_v28 }
 0x16b   : > { %739 = vst [vmem:[%s1547_s30 + $0x50] sm:$0xff] %v727_v40 }
 0x16c   : > { %740 = vst [vmem:[%s1547_s30 + $0x58] sm:$0xff] %v728_v34 }
 0x16d   : > { %1090 = shalt.err (!%p1087_p4)
}
 0x16e   : > { %s1091_s11 = scalar_lea.hbm %s1578_s7, 1536  ;;  %s1095_s28 = scalar_lea.hbm %s1630_s4, 3072 }
 0x16f   : > { %p1092_p5 = scmp.ne.s32.totalorder %s1578_s7, %s1091_s11  ;;  %p1096_p1 = scmp.lt.u32.totalorder %s1578_s7, %s1630_s4 }
 0x170   : > { %p1097_p3 = scmp.lt.u32.totalorder %s1095_s28, %s1091_s11  ;;  %p1099_p11 = scmp.lt.u32.totalorder %s1091_s11, %s1578_s7 }
 0x171   : > { %p1093_p7 = pnand %p1092_p5, %p1636_p12 }
 0x172   : > { %p1098_p6 = por %p1097_p3, %p1096_p1 }
 0x173   : > { %p1094_p9 = pneg %p1093_p7 }
 0x174   : > { %p1100_p13 = por %p1099_p11, %p1098_p6 }
 0x176   : > { %p1101_p8 = pnand %p1100_p13, %p1094_p9 }
 0x178   : > { %1104 = shalt.err (!%p1101_p8)
}
 0x179   : > { %s1150_s30 = smov 256   ;;  %s1151_s5 = smov 16  }
 0x17a   : > { %996 = dma.vmem_to_hbm [thread:$0]  (%p1636_p12), %s1580_s6, 1536, %s1578_s7, %s742_s19, %s1150_s30, %s1150_s30, %s1151_s5  }
 0x17b PF: > { %s770_s9 = sand.u32 1, %s1131_s15   ;;  %p1637_p10 = scmp.ne.s32.totalorder %s1634_s27, 0 }
 0x17c   : > { %p1638_p0 = scmp.ge.s32.totalorder %s1143_s18, 2  ;;  %s771_s14 = scalar_lea.sflag [#allocation4], %s770_s9 }
 0x17e   : > { %p1003_p2 = pnand %p1638_p0, %p1637_p10 }
 0x180   : > { %1126 = dma.done.wait (!%p1003_p2), %s771_s14, 1536  }
 0x181   : > { %1128 = vsyncadd (!%p1003_p2), %s771_s14, 4294965760  ;;  %p17_p4 = scmp.ge.s32.totalorder %s1202_s21, 4   ;;  %s1639_s15 = smov %s1135_s16 }
 0x182   : > { %s1640_s16 = smov %s1139_s17  ;;  %s1641_s17 = smov %s1214_s24 }
 0x183   : > { %s1642_s18 = smov %s1202_s21  ;;  %19 = sbr.rel (!%p17_p4) target bundleno = 5 (0x5), region = 87 }
 0x18a   :  { %776 = vsyncpa [#allocation3], 1 }
 0x18b   :  { %778 = vsyncpa [#allocation3 + $0x1], 1 }
 0x18c   :  { %779 = vsyncpa [#allocation4], 1 }
 0x18d   :  { %781 = vsyncpa [#allocation4 + $0x1], 1 }

</bundles_post_ra>
